<compile_context>
chip_gen: v5e
topology: v5e:2x2
jax: 0.10.0
libtpu: 0.0.40
codegen_flags: <defaults>
</compile_context>

<pallas_src>
import functools

import jax
import jax.numpy as jnp
from jax.experimental import pallas as pl
from jax.experimental.pallas import tpu as pltpu

LANE = 128


def _round_up(x, m):
    return ((x + m - 1) // m) * m


def _cdiv(a, b):
    return -(-a // b)


# ----------------------------------------------------------------------------
# Fused kernel: one batch tile of the entire MLP.
# refs = (x_ref, w_0 .. w_{L-1}, shift_ref, o_ref, h_scratch)
#   layer l < last : h = relu(h @ W'_l + shift_l)
#   last layer     : o = h @ W'_L + shift_L
# (BN scale folded into W', bias+BN mean folded into shift, dropout = identity)
# ----------------------------------------------------------------------------
def _fused_mlp_kernel(*refs, num_layers):
    x_ref = refs[0]
    w_refs = refs[1:1 + num_layers]
    shift_ref = refs[1 + num_layers]
    o_ref = refs[2 + num_layers]
    h_ref = refs[3 + num_layers]          # VMEM scratch for inter-layer acts

    h = x_ref[...]                        # (TM, in_dim) — un-padded input
    for l in range(num_layers):           # unrolled at trace time (few layers)
        w = w_refs[l][...]
        n_l = w.shape[1]                  # padded output width of this layer
        y = jnp.dot(h.astype(w.dtype), w, preferred_element_type=jnp.float32)
        y = y + shift_ref[l:l + 1, :n_l]  # (1, n_l) row broadcast, f32 epilogue
        if l < num_layers - 1:
            y = jnp.maximum(y, 0.0)
            # Carry the activation through VMEM scratch so large row tiles
            # don't keep a (TM, n_l) f32 value live in vregs across layers.
            h_ref[:, :n_l] = y
            h = h_ref[:, :n_l]
        else:
            o_ref[...] = y.astype(o_ref.dtype)


# ----------------------------------------------------------------------------
# Parameter construction (mirrors DNN.model_init).
# ----------------------------------------------------------------------------
def init_dnn_params(key, input_dim, hidden_dims, output_dim):
    """kaiming_normal weights, zero biases, default BatchNorm1d buffers."""
    dims = [input_dim] + list(hidden_dims)
    params = {"linears": [], "bns": []}
    for i in range(len(dims) - 1):
        key, wk = jax.random.split(key)
        fan_in, fan_out = dims[i], dims[i + 1]
        std = (2.0 / fan_in) ** 0.5
        w = std * jax.random.normal(wk, (fan_in, fan_out), dtype=jnp.float32)
        b = jnp.zeros((1, fan_out), dtype=jnp.float32)
        params["linears"].append((w, b))
        params["bns"].append(dict(
            gamma=jnp.ones((1, fan_out), jnp.float32),
            beta=jnp.zeros((1, fan_out), jnp.float32),
            running_mean=jnp.zeros((1, fan_out), jnp.float32),
            running_var=jnp.ones((1, fan_out), jnp.float32),
            eps=1e-5,
        ))
    key, wk = jax.random.split(key)
    fan_in = hidden_dims[-1]
    std = (2.0 / fan_in) ** 0.5
    w_out = std * jax.random.normal(wk, (fan_in, output_dim), dtype=jnp.float32)
    b_out = jnp.zeros((1, output_dim), dtype=jnp.float32)
    params["out"] = (w_out, b_out)
    return params


# ----------------------------------------------------------------------------
# One-time folding + padding (host side, at parameter-build time).
#   W'   = W * (gamma / sqrt(var + eps))              (scale folded into columns)
#   shift = beta + (b - mean) * scale                  (bias + BN folded)
# Layer 0 keeps its true K (so x needs no padding / copy); every N dim and all
# subsequent K dims are padded to `lane_multiple` (128 floor; use 256 for bf16
# on v6e/v7x to fill the 256x256 MXU).
# ----------------------------------------------------------------------------
def fold_dnn_params(params, lane_multiple=LANE, compute_dtype=jnp.float32):
    raw = []
    for (w, b), bn in zip(params["linears"], params["bns"]):
        inv = 1.0 / jnp.sqrt(bn["running_var"] + bn["eps"])
        scale = bn["gamma"] * inv                              # (1, N)
        shift = bn["beta"] + (b - bn["running_mean"]) * scale  # (1, N)
        raw.append((w * scale, shift.reshape(-1)))
    w_out, b_out = params["out"]
    raw.append((w_out, b_out.reshape(-1)))                     # plain linear

    weights, shifts = [], []
    for l, (w_f, shift) in enumerate(raw):
        K, N = w_f.shape
        Kp = K if l == 0 else _round_up(K, lane_multiple)      # layer-0 K unpadded
        Np = _round_up(N, lane_multiple)
        w_p = jnp.zeros((Kp, Np), compute_dtype).at[:K, :N].set(
            w_f.astype(compute_dtype))
        sh_p = jnp.zeros((Np,), jnp.float32).at[:N].set(shift)
        weights.append(w_p)
        shifts.append(sh_p)

    np_max = max(w.shape[1] for w in weights)
    n_rows = _round_up(len(weights), 8)                        # sublane-friendly
    shift_stack = jnp.zeros((n_rows, np_max), jnp.float32)
    for l, sh in enumerate(shifts):
        shift_stack = shift_stack.at[l, :sh.shape[0]].set(sh)

    return {"weights": weights, "shift": shift_stack,
            "input_dim": params["linears"][0][0].shape[0],
            "output_dim": params["out"][0].shape[1]}


def _resident_spec(shape):
    """BlockSpec for tensors whose block index never changes across the grid:
    a single pipeline buffer avoids pointless double-buffered VMEM."""
    idx = lambda i: (0, 0)
    try:
        return pl.BlockSpec(shape, idx, pipeline_mode=pl.Buffered(1))
    except (AttributeError, TypeError):   # older Pallas: fall back to default
        return pl.BlockSpec(shape, idx)


# ----------------------------------------------------------------------------
# Forward pass: single fused pallas_call, no input padding, ragged row grid.
# ----------------------------------------------------------------------------
def dnn_forward_pallas(folded, x, *, trim_output_cols=True):
    weights = folded["weights"]
    shift = folded["shift"]
    num_layers = len(weights)
    M, in_dim = x.shape
    assert in_dim == folded["input_dim"]
    nout_p = weights[-1].shape[1]
    np_hidden_max = max((w.shape[1] for w in weights[:-1]), default=LANE)

    # Row tile: large tiles amortize the ~0.35us/step overhead; cap at 512 f32
    # rows and keep >= 2 row-blocks for big batches so the "parallel" grid axis
    # can be split across TensorCores (v7x has 2 TC/chip).
    TM = min(512, _round_up(M, 8))
    if M > 128 and _cdiv(M, TM) < 2:
        TM = _round_up(_cdiv(M, 2), 8)
    grid = (_cdiv(M, TM),)                # ragged last block: garbage rows are
                                          # computed but never stored (out has
                                          # exactly M rows).

    in_specs = [pl.BlockSpec((TM, in_dim), lambda i: (i, 0))]   # x (un-padded)
    args = [x]
    for w in weights:                                           # resident weights
        in_specs.append(_resident_spec(w.shape))
        args.append(w)
    in_specs.append(_resident_spec(shift.shape))                # stacked shifts
    args.append(shift)

    # Explicit VMEM budget (v5e scoped default is only 16 MiB; v7x has 64 MiB
    # physical).  Beyond ~64 MiB resident weights a K/N-tiled path is needed.
    weight_bytes = sum(int(w.size) * w.dtype.itemsize for w in weights)
    need = (weight_bytes
            + int(shift.size) * 4
            + TM * in_dim * x.dtype.itemsize * 2      # x, double-buffered
            + TM * nout_p * x.dtype.itemsize * 2      # out, double-buffered
            + TM * np_hidden_max * 4)                 # activation scratch
    vmem_limit = int(max(32 << 20, min(2 * need + (2 << 20), 64 << 20)))

    out = pl.pallas_call(
        functools.partial(_fused_mlp_kernel, num_layers=num_layers),
        out_shape=jax.ShapeDtypeStruct((M, nout_p), x.dtype),
        grid=grid,
        in_specs=in_specs,
        out_specs=pl.BlockSpec((TM, nout_p), lambda i: (i, 0)),
        scratch_shapes=[pltpu.VMEM((TM, np_hidden_max), jnp.float32)],
        compiler_params=pltpu.CompilerParams(
            dimension_semantics=("parallel",),
            vmem_limit_bytes=vmem_limit),
    )(*args)

    if trim_output_cols and nout_p != folded["output_dim"]:
        # Optional: downstream consumers that accept the padded 128-lane slab
        # can pass trim_output_cols=False and skip this extra XLA copy.
        out = out[:, :folded["output_dim"]]
    return out


# ----------------------------------------------------------------------------
# Pure-JAX reference (eval-mode PyTorch semantics, un-folded params).
# ----------------------------------------------------------------------------
def dnn_forward_ref(params, x):
    for (w, b), bn in zip(params["linears"], params["bns"]):
        y = x @ w + b
        y = (y - bn["running_mean"]) / jnp.sqrt(bn["running_var"] + bn["eps"])
        y = y * bn["gamma"] + bn["beta"]
        x = jnp.maximum(y, 0.0)
    w, b = params["out"]
    return x @ w + b


if __name__ == "__main__":
    key = jax.random.PRNGKey(0)
    input_dim, hidden_dims, output_dim = 32, [64, 32], 8

    pkey, xkey_small, xkey_big = jax.random.split(key, 3)
    params = init_dnn_params(pkey, input_dim, hidden_dims, output_dim)
    folded = fold_dnn_params(params)

    # Two batch sizes: small (single block) and one that exercises a multi-block
    # ragged grid (grid=2, last row-block partially out of bounds).
    for batch, xk in ((16, xkey_small), (200, xkey_big)):
        x = jax.random.normal(xk, (batch, input_dim), dtype=jnp.float32)
        out = jax.block_until_ready(dnn_forward_pallas(folded, x))
        ref = dnn_forward_ref(params, x)
        assert out.shape == (batch, output_dim)
        assert jnp.allclose(out, ref, atol=1e-4, rtol=1e-4), \
            "mismatch vs JAX reference"

    print("KERNEL_OK")
</pallas_src>

<mosaic_0001>
module attributes {stable_mosaic.version = 11 : i64} {
  func.func @_fused_mlp_kernel(%arg0: i32, %arg1: memref<16x32xf32, #tpu.memory_space<vmem>>, %arg2: memref<32x128xf32, #tpu.memory_space<vmem>>, %arg3: memref<128x128xf32, #tpu.memory_space<vmem>>, %arg4: memref<128x128xf32, #tpu.memory_space<vmem>>, %arg5: memref<8x128xf32, #tpu.memory_space<vmem>>, %arg6: memref<16x128xf32, #tpu.memory_space<vmem>>, %arg7: memref<16x128xf32, #tpu.memory_space<vmem>>) attributes {dimension_semantics = [#tpu.dimension_semantics<parallel>], iteration_bounds = array<i64: 1>, scalar_prefetch = 0 : i64, scratch_operands = 1 : i64, tpu.core_type = #tpu.core_type<tc>, window_params = [{transform_indices = @transform_0, window_bounds = array<i64: 16, 32>}, {pipeline_mode = #tpu.pipeline_mode<synchronous>, transform_indices = @transform_1, window_bounds = array<i64: 32, 128>}, {pipeline_mode = #tpu.pipeline_mode<synchronous>, transform_indices = @transform_2, window_bounds = array<i64: 128, 128>}, {pipeline_mode = #tpu.pipeline_mode<synchronous>, transform_indices = @transform_3, window_bounds = array<i64: 128, 128>}, {pipeline_mode = #tpu.pipeline_mode<synchronous>, transform_indices = @transform_4, window_bounds = array<i64: 8, 128>}, {transform_indices = @transform_5, window_bounds = array<i64: 16, 128>}]} {
    %c0 = arith.constant 0 : index
    %c0_0 = arith.constant 0 : index
    %0 = vector.load %arg1[%c0, %c0_0] : memref<16x32xf32, #tpu.memory_space<vmem>>, vector<16x32xf32>
    %c0_1 = arith.constant 0 : index
    %c0_2 = arith.constant 0 : index
    %1 = vector.load %arg2[%c0_1, %c0_2] : memref<32x128xf32, #tpu.memory_space<vmem>>, vector<32x128xf32>
    %cst = arith.constant dense<0.000000e+00> : vector<16x128xf32>
    %2 = tpu.matmul %0, %1, %cst {dimension_numbers = #tpu.dot_dimension_numbers<[1], [0], [0], [1], [0, 0, 1, 1], [], []>} : vector<16x32xf32>, vector<32x128xf32>, vector<16x128xf32> -> vector<16x128xf32>
    %c0_3 = arith.constant 0 : index
    %c0_4 = arith.constant 0 : index
    %3 = vector.load %arg5[%c0_3, %c0_4] : memref<8x128xf32, #tpu.memory_space<vmem>>, vector<1x128xf32>
    %4 = vector.broadcast %3 : vector<1x128xf32> to vector<16x128xf32>
    %5 = arith.addf %2, %4 : vector<16x128xf32>
    %cst_5 = arith.constant 0.000000e+00 : f32
    %6 = vector.broadcast %cst_5 : f32 to vector<16x128xf32>
    %7 = arith.maximumf %5, %6 : vector<16x128xf32>
    %c0_6 = arith.constant 0 : index
    %c0_7 = arith.constant 0 : index
    %8 = vector.load %arg7[%c0_6, %c0_7] : memref<16x128xf32, #tpu.memory_space<vmem>>, vector<16x128xf32>
    tpu.vector_store %arg7[%c0_6, %c0_7], %7 {strides = array<i32>} : memref<16x128xf32, #tpu.memory_space<vmem>>, vector<16x128xf32>,
    %c0_8 = arith.constant 0 : index
    %c0_9 = arith.constant 0 : index
    %9 = vector.load %arg7[%c0_8, %c0_9] : memref<16x128xf32, #tpu.memory_space<vmem>>, vector<16x128xf32>
    %c0_10 = arith.constant 0 : index
    %c0_11 = arith.constant 0 : index
    %10 = vector.load %arg3[%c0_10, %c0_11] : memref<128x128xf32, #tpu.memory_space<vmem>>, vector<128x128xf32>
    %cst_12 = arith.constant dense<0.000000e+00> : vector<16x128xf32>
    %11 = tpu.matmul %9, %10, %cst_12 {dimension_numbers = #tpu.dot_dimension_numbers<[1], [0], [0], [1], [0, 0, 1, 1], [], []>} : vector<16x128xf32>, vector<128x128xf32>, vector<16x128xf32> -> vector<16x128xf32>
    %c1 = arith.constant 1 : index
    %c0_13 = arith.constant 0 : index
    %12 = vector.load %arg5[%c1, %c0_13] : memref<8x128xf32, #tpu.memory_space<vmem>>, vector<1x128xf32>
    %13 = vector.broadcast %12 : vector<1x128xf32> to vector<16x128xf32>
    %14 = arith.addf %11, %13 : vector<16x128xf32>
    %cst_14 = arith.constant 0.000000e+00 : f32
    %15 = vector.broadcast %cst_14 : f32 to vector<16x128xf32>
    %16 = arith.maximumf %14, %15 : vector<16x128xf32>
    %c0_15 = arith.constant 0 : index
    %c0_16 = arith.constant 0 : index
    %17 = vector.load %arg7[%c0_15, %c0_16] : memref<16x128xf32, #tpu.memory_space<vmem>>, vector<16x128xf32>
    tpu.vector_store %arg7[%c0_15, %c0_16], %16 {strides = array<i32>} : memref<16x128xf32, #tpu.memory_space<vmem>>, vector<16x128xf32>,
    %c0_17 = arith.constant 0 : index
    %c0_18 = arith.constant 0 : index
    %18 = vector.load %arg7[%c0_17, %c0_18] : memref<16x128xf32, #tpu.memory_space<vmem>>, vector<16x128xf32>
    %c0_19 = arith.constant 0 : index
    %c0_20 = arith.constant 0 : index
    %19 = vector.load %arg4[%c0_19, %c0_20] : memref<128x128xf32, #tpu.memory_space<vmem>>, vector<128x128xf32>
    %cst_21 = arith.constant dense<0.000000e+00> : vector<16x128xf32>
    %20 = tpu.matmul %18, %19, %cst_21 {dimension_numbers = #tpu.dot_dimension_numbers<[1], [0], [0], [1], [0, 0, 1, 1], [], []>} : vector<16x128xf32>, vector<128x128xf32>, vector<16x128xf32> -> vector<16x128xf32>
    %c2 = arith.constant 2 : index
    %c0_22 = arith.constant 0 : index
    %21 = vector.load %arg5[%c2, %c0_22] : memref<8x128xf32, #tpu.memory_space<vmem>>, vector<1x128xf32>
    %22 = vector.broadcast %21 : vector<1x128xf32> to vector<16x128xf32>
    %23 = arith.addf %20, %22 : vector<16x128xf32>
    %c0_23 = arith.constant 0 : index
    %c0_24 = arith.constant 0 : index
    %24 = vector.load %arg6[%c0_23, %c0_24] : memref<16x128xf32, #tpu.memory_space<vmem>>, vector<16x128xf32>
    tpu.vector_store %arg6[%c0_23, %c0_24], %23 {strides = array<i32>} : memref<16x128xf32, #tpu.memory_space<vmem>>, vector<16x128xf32>,
    return
  }
  func.func @transform_0(%arg0: i32) -> (i32, i32) {
    %c0_i32 = arith.constant 0 : i32
    %c0_i32_0 = arith.constant 0 : i32
    return %arg0, %c0_i32 : i32, i32
  }
  func.func @transform_1(%arg0: i32) -> (i32, i32) {
    %c0_i32 = arith.constant 0 : i32
    %c0_i32_0 = arith.constant 0 : i32
    %c0_i32_1 = arith.constant 0 : i32
    return %c0_i32, %c0_i32_0 : i32, i32
  }
  func.func @transform_2(%arg0: i32) -> (i32, i32) {
    %c0_i32 = arith.constant 0 : i32
    %c0_i32_0 = arith.constant 0 : i32
    %c0_i32_1 = arith.constant 0 : i32
    return %c0_i32, %c0_i32_0 : i32, i32
  }
  func.func @transform_3(%arg0: i32) -> (i32, i32) {
    %c0_i32 = arith.constant 0 : i32
    %c0_i32_0 = arith.constant 0 : i32
    %c0_i32_1 = arith.constant 0 : i32
    return %c0_i32, %c0_i32_0 : i32, i32
  }
  func.func @transform_4(%arg0: i32) -> (i32, i32) {
    %c0_i32 = arith.constant 0 : i32
    %c0_i32_0 = arith.constant 0 : i32
    %c0_i32_1 = arith.constant 0 : i32
    return %c0_i32, %c0_i32_0 : i32, i32
  }
  func.func @transform_5(%arg0: i32) -> (i32, i32) {
    %c0_i32 = arith.constant 0 : i32
    %c0_i32_0 = arith.constant 0 : i32
    return %arg0, %c0_i32 : i32, i32
  }
}

</mosaic_0001>

<bundles_post_ra>
// kernel: tpu_custom_call.1
= control target key start
LH: loop header
LB: loop body
LE: loop exit
PB: predicated region body
PF: predicated region fallthrough
CT: control target
= control target key end

     0   :  { %10 = vsyncpa [#allocation4], 0  ;;  %s506_s0 = inlined_call_operand.hbm [shape: f32[16,32], index: 0, kind: input, shape index: {}]   ;;  %s507_s1 = inlined_call_operand.hbm [shape: f32[32,128], index: 1, kind: input, shape index: {}]   ;;  %s508_s2 = inlined_call_operand.hbm [shape: f32[128,128], index: 2, kind: input, shape index: {}]   ;;  %s509_s3 = inlined_call_operand.hbm [shape: f32[128,128], index: 3, kind: input, shape index: {}]   ;;  %s510_s4 = inlined_call_operand.hbm [shape: f32[8,128], index: 4, kind: input, shape index: {}]   ;;  %s511_s5 = inlined_call_operand.hbm [shape: f32[16,128], index: 5, kind: output, shape index: {}]  }
   0x1   :  { %11 = vsyncpa [#allocation7], 0 }
   0x2   :  { %12 = vsyncpa [#allocation10], 0 }
   0x3   :  { %13 = vsyncpa [#allocation5], 0  ;;  %s31_s20 = sshll.u32 %s507_s1, 4  ;;  %s433_s21 = smov [#allocation6]   ;;  %s32_s20 = int_to_ptr.hbm [resolvable:$true] %s31_s20 }
   0x4   :  { %s33_s22 = sshll.u32 %s433_s21, 4  ;;  %s57_s25 = sshll.u32 %s509_s3, 4  ;;  %s34_s22 = int_to_ptr.vmem [resolvable:$true] %s33_s22  ;;  %s58_s25 = int_to_ptr.hbm [resolvable:$true] %s57_s25 }
   0x5   :  { %s434_s26 = smov 128   ;;  %s435_s27 = smov 8  }
   0x6   :  { %39 = dma.hbm_to_vmem [thread:$0]  %s32_s20, 512, %s34_s22, [#allocation7], %s434_s26, %s434_s26, %s435_s27  }
   0x7   :  { %s436_s28 = smov [#allocation9]   ;;  %s18_s1 = sshll.u32 %s506_s0, 4  ;;  %s19_s1 = int_to_ptr.hbm [resolvable:$true] %s18_s1 }
   0x8   :  { %s59_s29 = sshll.u32 %s436_s28, 4  ;;  %s44_s8 = sshll.u32 %s508_s2, 4  ;;  %s60_s29 = int_to_ptr.vmem [resolvable:$true] %s59_s29  ;;  %s45_s8 = int_to_ptr.hbm [resolvable:$true] %s44_s8 }
   0x9   :  { %65 = dma.hbm_to_vmem [thread:$0]  %s58_s25, 2048, %s60_s29, [#allocation10], %s434_s26, %s434_s26, %s435_s27  }
   0xa   :  { %s437_s9 = smov [#allocation3]   ;;  %s438_s11 = smov [#allocation8]  }
   0xb   :  { %s20_s10 = sshll.u32 %s437_s9, 4  ;;  %s46_s0 = sshll.u32 %s438_s11, 4  ;;  %s21_s10 = int_to_ptr.vmem [resolvable:$true] %s20_s10  ;;  %s47_s0 = int_to_ptr.vmem [resolvable:$true] %s46_s0 }
   0xc   :  { %26 = dma.hbm_to_vmem [thread:$0]  %s19_s1, 256, %s21_s10, [#allocation4], %s434_s26, %s434_s26, %s435_s27  }
   0xd   :  { %s71_s14 = sshll.u32 %s510_s4, 4  ;;  %s439_s2 = smov [#allocation11]   ;;  %s72_s14 = int_to_ptr.hbm [resolvable:$true] %s71_s14 }
   0xe   :  { %52 = dma.hbm_to_vmem [thread:$0]  %s45_s8, 2048, %s47_s0, [#allocation7], %s434_s26, %s434_s26, %s435_s27  }
   0xf   :  { %s73_s15 = sshll.u32 %s439_s2, 4  ;;  %s74_s15 = int_to_ptr.vmem [resolvable:$true] %s73_s15 }
  0x10   :  { %76 = dma.hbm_to_vmem [thread:$0]  %s72_s14, 128, %s74_s15, [#allocation10]  }
  0x11   :  { %425 = dma.done.wait [#allocation4], 256  }
  0x12   :  { %426 = vsyncadd [#allocation4], 4294967040 }
  0x13   :  { %427 = dma.done.wait [#allocation7], 2560  }
  0x14   :  { %428 = vsyncadd [#allocation7], 4294964736 }
  0x15   :  { %429 = dma.done.wait [#allocation10], 2176  }
  0x16   :  { %430 = vsyncadd [#allocation10], 4294965120  ;;  %v102_v0 = vld [vmem:[#allocation6 + $0x18] sm:$0xff]  ;;  %v101_v1 = vld [vmem:[#allocation6 + $0x10] sm:$0xff]  ;;  %vm105_vm0 = vcmask 261120   ;;  %s440_s4 = smov [#allocation12]  }
  0x17   :  { %124 = vmatpush.msra.mxu0 %v102_v0  ;;  %v100_v2 = vld [vmem:[#allocation6 + $0x8] sm:$0xff]  ;;  %v156_v3 = vld [vmem:[#allocation8 + $0x78] sm:$0xff]  ;;  %v155_v4 = vld [vmem:[#allocation8 + $0x70] sm:$0xff]  ;;  %s235_s16 = sshll.u32 %s440_s4, 4  ;;  %s237_s19 = sshll.u32 %s511_s5, 4  ;;  %s236_s16 = int_to_ptr.vmem [resolvable:$true] %s235_s16  ;;  %s238_s19 = int_to_ptr.hbm [resolvable:$true] %s237_s19 }
  0x18   :  { %159 = vmatpush.msra.mxu1 %v156_v3  ;;  %v99_v5 = vld [vmem:[#allocation6] sm:$0xff]  ;;  %v154_v6 = vld [vmem:[#allocation8 + $0x68] sm:$0xff]  ;;  %254 = vmatpush.msra.mxu3 %v156_v3  ;;  %v97_v7 = vld [vmem:[#allocation3] sm:$0xff] }
  0x19   :  { %125 = vmatpush.msra.mxu0 %v101_v1  ;;  %v153_v8 = vld [vmem:[#allocation8 + $0x60] sm:$0xff]  ;;  %v152_v9 = vld [vmem:[#allocation8 + $0x58] sm:$0xff]  ;;  %v151_v10 = vld [vmem:[#allocation8 + $0x50] sm:$0xff] }
  0x1a   :  { %160 = vmatpush.msra.mxu1 %v155_v4  ;;  %255 = vmatpush.msra.mxu3 %v155_v4  ;;  %v150_v11 = vld [vmem:[#allocation8 + $0x48] sm:$0xff]  ;;  %v98_v12 = vld [vmem:[#allocation3 + $0x8] sm:$0xff]  ;;  %v149_v13 = vld [vmem:[#allocation8 + $0x40] sm:$0xff] }
  0x1b   :  { %126 = vmatpush.msra.mxu0 %v100_v2  ;;  %v148_v14 = vld [vmem:[#allocation8 + $0x38] sm:$0xff]  ;;  %v147_v15 = vld [vmem:[#allocation8 + $0x30] sm:$0xff]  ;;  %v146_v16 = vld [vmem:[#allocation8 + $0x28] sm:$0xff] }
  0x1c   :  { %161 = vmatpush.msra.mxu1 %v154_v6  ;;  %256 = vmatpush.msra.mxu3 %v154_v6  ;;  %v145_v17 = vld [vmem:[#allocation8 + $0x20] sm:$0xff]  ;;  %v144_v18 = vld [vmem:[#allocation8 + $0x18] sm:$0xff]  ;;  %v143_v19 = vld [vmem:[#allocation8 + $0x10] sm:$0xff] }
  0x1d   :  { %127 = vmatpush.msra.mxu0 %v99_v5  ;;  %v142_v20 = vld [vmem:[#allocation8 + $0x8] sm:$0xff]  ;;  %v141_v21 = vld [vmem:[#allocation8] sm:$0xff]  ;;  %v203_v22 = vld [vmem:[#allocation9 + $0x78] sm:$0xff] }
  0x1e   :  { %252 = vmatmul.msk.f32.vlgmr.msra.gmra.mxu0 %vm105_vm0, %v97_v7  ;;  %162 = vmatpush.msra.mxu1 %v153_v8  ;;  %v202_v23 = vld [vmem:[#allocation9 + $0x70] sm:$0xff]  ;;  %v201_v24 = vld [vmem:[#allocation9 + $0x68] sm:$0xff]  ;;  %v200_v25 = vld [vmem:[#allocation9 + $0x60] sm:$0xff] }
  0x1f   :  { %257 = vmatpush.msra.mxu3 %v153_v8  ;;  %206 = vmatpush.msra.mxu2 %v203_v22  ;;  %v199_v26 = vld [vmem:[#allocation9 + $0x58] sm:$0xff]  ;;  %v198_v27 = vld [vmem:[#allocation9 + $0x50] sm:$0xff]  ;;  %v197_v28 = vld [vmem:[#allocation9 + $0x48] sm:$0xff] }
  0x20   :  { %163 = vmatpush.msra.mxu1 %v152_v9  ;;  %v196_v29 = vld [vmem:[#allocation9 + $0x40] sm:$0xff]  ;;  %v195_v30 = vld [vmem:[#allocation9 + $0x38] sm:$0xff]  ;;  %v194_v32 = vld [vmem:[#allocation9 + $0x30] sm:$0xff] }
  0x21   :  { %258 = vmatpush.msra.mxu3 %v152_v9  ;;  %207 = vmatpush.msra.mxu2 %v202_v23  ;;  %v278_v31 = vld [vmem:[#allocation11] ss:$0 sm:$0xff]  ;;  %v193_v33 = vld [vmem:[#allocation9 + $0x28] sm:$0xff]  ;;  %v191_v38 = vld [vmem:[#allocation9 + $0x18] sm:$0xff] }
  0x22   :  { %164 = vmatpush.msra.mxu1 %v151_v10  ;;  %v192_v36 = vld [vmem:[#allocation9 + $0x20] sm:$0xff]  ;;  %v190_v42 = vld [vmem:[#allocation9 + $0x10] sm:$0xff]  ;;  %v189_v43 = vld [vmem:[#allocation9 + $0x8] sm:$0xff] }
  0x23   :  { %259 = vmatpush.msra.mxu3 %v151_v10  ;;  %208 = vmatpush.msra.mxu2 %v201_v24  ;;  %v188_v44 = vld [vmem:[#allocation9] sm:$0xff] }
  0x24   :  { %165 = vmatpush.msra.mxu1 %v150_v11  ;;  %v279_v45 = vld [vmem:[#allocation11 + $0x1] ss:$0 sm:$0xff]  ;;  %v280_v52 = vld [vmem:[#allocation11 + $0x2] ss:$0 sm:$0xff] }
  0x25   :  { %260 = vmatpush.msra.mxu3 %v150_v11  ;;  %209 = vmatpush.msra.mxu2 %v200_v25 }
  0x26   :  { %253 = vmatmul.msk.f32.gmra.mxu0 %vm105_vm0, %v98_v12  ;;  %166 = vmatpush.msra.mxu1 %v149_v13 }
  0x27   :  { %261 = vmatpush.msra.mxu3 %v149_v13  ;;  %210 = vmatpush.msra.mxu2 %v199_v26 }
  0x28   :  { %167 = vmatpush.msra.mxu1 %v148_v14 }
  0x29   :  { %262 = vmatpush.msra.mxu3 %v148_v14  ;;  %211 = vmatpush.msra.mxu2 %v198_v27 }
  0x2a   :  { %168 = vmatpush.msra.mxu1 %v147_v15 }
  0x2b   :  { %263 = vmatpush.msra.mxu3 %v147_v15  ;;  %212 = vmatpush.msra.mxu2 %v197_v28 }
  0x2c   :  { %169 = vmatpush.msra.mxu1 %v146_v16 }
  0x2d   :  { %264 = vmatpush.msra.mxu3 %v146_v16  ;;  %213 = vmatpush.msra.mxu2 %v196_v29 }
  0x2e   :  { %170 = vmatpush.msra.mxu1 %v145_v17 }
  0x2f   :  { %265 = vmatpush.msra.mxu3 %v145_v17  ;;  %214 = vmatpush.msra.mxu2 %v195_v30 }
  0x30   :  { %171 = vmatpush.msra.mxu1 %v144_v18 }
  0x31   :  { %266 = vmatpush.msra.mxu3 %v144_v18  ;;  %215 = vmatpush.msra.mxu2 %v194_v32 }
  0x32   :  { %172 = vmatpush.msra.mxu1 %v143_v19 }
  0x33   :  { %267 = vmatpush.msra.mxu3 %v143_v19  ;;  %216 = vmatpush.msra.mxu2 %v193_v33 }
  0x34   :  { %173 = vmatpush.msra.mxu1 %v142_v20 }
  0x35   :  { %268 = vmatpush.msra.mxu3 %v142_v20  ;;  %217 = vmatpush.msra.mxu2 %v192_v36 }
  0x36   :  { %174 = vmatpush.msra.mxu1 %v141_v21 }
  0x37   :  { %269 = vmatpush.msra.mxu3 %v141_v21  ;;  %218 = vmatpush.msra.mxu2 %v191_v38 }
  0x39   :  { %219 = vmatpush.msra.mxu2 %v190_v42 }
  0x3b   :  { %220 = vmatpush.msra.mxu2 %v189_v43 }
  0x3d   :  { %221 = vmatpush.msra.mxu2 %v188_v44 }
  0x9b   :  { %v129_v34 = vpop.f32.mrf.mxu0 }
  0x9c   :  { %v130_v35 = vadd.f32 %v278_v31, %v129_v34 }
  0x9e   :  { %v135_v37 = vmax.f32 %v130_v35, 0.0 }
  0xa0   :  { %175 = vmatmul.f32.vlgmr.msra.gmra.mxu1 %v135_v37 }
  0xa3   :  { %v132_v39 = vpop.f32.mrf.mxu0 }
  0xa4   :  { %v133_v40 = vadd.f32 %v278_v31, %v132_v39 }
  0xa6   :  { %v136_v41 = vmax.f32 %v133_v40, 0.0 }
  0xa8   :  { %178 = vmatmul.f32.vlgmr.msra.gmra.mxu3 %v136_v41 }
 0x11d   :  { %v176_v46 = vpop.f32.mrf.mxu1 }
 0x11e   :  { %v177_v47 = vadd.f32 %v279_v45, %v176_v46 }
 0x120   :  { %v182_v48 = vmax.f32 %v177_v47, 0.0 }
 0x122   :  { %222 = vmatmul.f32.vlgmr.msra.gmra.mxu2 %v182_v48 }
 0x12b   :  { %v179_v49 = vpop.f32.mrf.mxu3 }
 0x12c   :  { %v180_v50 = vadd.f32 %v279_v45, %v179_v49 }
 0x12e   :  { %v183_v51 = vmax.f32 %v180_v50, 0.0 }
 0x130   :  { %225 = vmatmul.f32.gmra.mxu2 %v183_v51 }
 0x1a5   :  { %v223_v53 = vpop.f32.mrf.mxu2 }
 0x1a6   :  { %v224_v54 = vadd.f32 %v280_v52, %v223_v53 }
 0x1a8   :  { %229 = vst [vmem:[#allocation12] sm:$0xff] %v224_v54 }
 0x1b3   :  { %v226_v55 = vpop.f32.mrf.mxu2 }
 0x1b4   :  { %v227_v56 = vadd.f32 %v280_v52, %v226_v55 }
 0x1b6   :  { %230 = vst [vmem:[#allocation12 + $0x8] sm:$0xff] %v227_v56 }
 0x1b7   :  { %243 = dma.vmem_to_hbm [thread:$0]  %s236_s16, 256, %s238_s19, [#allocation5], %s434_s26, %s434_s26, %s435_s27  }
 0x1b8   :  { %431 = dma.done.wait [#allocation5], 256  }
 0x1b9   :  { %432 = vsyncadd [#allocation5], 4294967040 }
 0x1ba   :  { %248 = vsyncpa [#allocation4], 1 }
 0x1bb   :  { %249 = vsyncpa [#allocation7], 1 }
 0x1bc   :  { %250 = vsyncpa [#allocation10], 1 }
 0x1bd   :  { %251 = vsyncpa [#allocation5], 1 }

</bundles_post_ra>
